<compile_context>
chip_gen: v6e
topology: v6e:2x2x1
jax: 0.10.0
libtpu: 0.0.40
codegen_flags: <defaults>
</compile_context>

<pallas_src>
import functools

import jax
import jax.numpy as jnp
from jax.experimental import pallas as pl
from jax.experimental.pallas import tpu as pltpu

# ----------------------------- config -----------------------------
RESNET_REPRESENTATION_DIM = 16   # ch_in
NUM_HIDDEN_NODES_COND = 32       # H
NUM_HIDDEN_LAYERS_COND = 2
NUM_COND_NODES = 8               # ch_out
BATCH_NORM_COND = True
DROPOUT_COND = 0.0               # p == 0.0 -> no Dropout module is added
BN_EPS = 1e-5
BATCH = 8


# ----------------------------- param packing -----------------------------
def _align8(r):
    return ((r + 7) // 8) * 8


def pack_params(params):
    """Pack [W0,b0,g0,be0, W1,b1,g1,be1, ..., W_out,b_out] into one buffer.

    Returns (packed, layout):
      packed : (rows, H) f32, every segment starts on an 8-row boundary,
               output W/b are lane-padded with zeros from ch_out to H.
      layout : {"bn": ((w_off, w_rows, gb_off), ...), "out": (w_off, w_rows, b_off)}

    The BN-layer Linear biases are NOT packed: under training-mode batch
    statistics mean(h + b) = mean(h) + b, so the bias cancels exactly in the
    normalization. (Only valid while BATCH_NORM_COND is True.)
    """
    assert BATCH_NORM_COND, "bias-drop packing requires training-mode BatchNorm"
    H = NUM_HIDDEN_NODES_COND
    n_bn = 1 + NUM_HIDDEN_LAYERS_COND

    def pad_seg(a, rows):
        return jnp.pad(a.astype(jnp.float32),
                       ((0, rows - a.shape[0]), (0, H - a.shape[1])))

    segs = []
    bn_layout = []
    row = 0
    idx = 0
    for _ in range(n_bn):
        w, _b, g, be = params[idx], params[idx + 1], params[idx + 2], params[idx + 3]
        idx += 4
        w_rows = w.shape[0]
        w_rows_p = _align8(w_rows)
        segs.append(pad_seg(w, w_rows_p))
        segs.append(pad_seg(jnp.concatenate([g, be], axis=0), 8))   # gamma row, beta row
        bn_layout.append((row, w_rows, row + w_rows_p))
        row += w_rows_p + 8

    w_out, b_out = params[idx], params[idx + 1]
    wo_rows = w_out.shape[0]
    wo_rows_p = _align8(wo_rows)
    segs.append(pad_seg(w_out, wo_rows_p))   # (H, ch_out) zero-padded to (H, H)
    segs.append(pad_seg(b_out, 8))
    out_layout = (row, wo_rows, row + wo_rows_p)

    packed = jnp.concatenate(segs, axis=0)
    layout = {"bn": tuple(bn_layout), "out": out_layout}
    return packed, layout


# ----------------------------- kernel -----------------------------
def _condnet_kernel(layout, inv_b, x_ref, p_ref, o_ref):
    """Fused MLP: (Linear + BatchNorm1d(train) + ReLU) * n_bn, then Linear.

    x_ref : (B, ch_in)  VMEM
    p_ref : (rows, H)   VMEM packed parameter slab (see pack_params)
    o_ref : (B, H)      VMEM lane-padded output (cols >= ch_out are zero)
    """
    h = x_ref[...].astype(jnp.float32)

    for (w_off, w_rows, gb_off) in layout["bn"]:
        w = p_ref[w_off:w_off + w_rows, :]
        gamma = p_ref[gb_off:gb_off + 1, :]
        beta = p_ref[gb_off + 1:gb_off + 2, :]

        # Linear (bias dropped — cancels under training-mode BN), MXU matmul.
        h = jnp.dot(h, w, preferred_element_type=jnp.float32)

        # One-pass training-mode batch statistics (biased variance).
        s1 = jnp.sum(h, axis=0, keepdims=True)
        s2 = jnp.sum(h * h, axis=0, keepdims=True)
        mean = s1 * inv_b
        var = s2 * inv_b - mean * mean

        # Folded BN + ReLU: scale = gamma * rsqrt(var + eps).
        scale = gamma * jax.lax.rsqrt(var + BN_EPS)
        h = jnp.maximum(h * scale + (beta - mean * scale), 0.0)
        # Dropout(p=0.0) is a no-op (module is not even added by __init__).

    wo_off, wo_rows, bo_off = layout["out"]
    w_out = p_ref[wo_off:wo_off + wo_rows, :]   # (H, H), cols >= ch_out are zero
    b_out = p_ref[bo_off:bo_off + 1, :]
    o_ref[...] = jnp.dot(h, w_out, preferred_element_type=jnp.float32) + b_out


# ----------------------------- wrapper -----------------------------
def condnet_forward(x, packed, layout):
    B = x.shape[0]
    H = NUM_HIDDEN_NODES_COND
    n_bn = 1 + NUM_HIDDEN_LAYERS_COND

    # Advisory cost estimate (matmul flops + reductions; rsqrt -> EUP).
    flops = 2 * B * (RESNET_REPRESENTATION_DIM * H + NUM_HIDDEN_LAYERS_COND * H * H + H * H)
    flops += 8 * B * H * n_bn           # BN / ReLU elementwise + reductions (rough)
    bytes_accessed = 4 * (x.size + packed.size + B * H)

    kernel = functools.partial(_condnet_kernel, layout, 1.0 / float(B))
    out_padded = pl.pallas_call(
        kernel,
        out_shape=jax.ShapeDtypeStruct((B, H), jnp.float32),
        in_specs=[pl.BlockSpec(memory_space=pltpu.MemorySpace.VMEM)] * 2,
        out_specs=pl.BlockSpec(memory_space=pltpu.MemorySpace.VMEM),
        cost_estimate=pl.CostEstimate(flops=flops, transcendentals=n_bn * H,
                                      bytes_accessed=bytes_accessed),
    )(x, packed)
    # Lane-padded slab -> actual ch_out columns.
    return out_padded[:, :NUM_COND_NODES]


# ----------------------------- param init -----------------------------
def init_params(key):
    """Deterministic init mimicking PyTorch Linear defaults (U[-1/sqrt(fan_in), +])."""
    dims = ([RESNET_REPRESENTATION_DIM]
            + [NUM_HIDDEN_NODES_COND] * (1 + NUM_HIDDEN_LAYERS_COND)
            + [NUM_COND_NODES])
    params = []
    n_layers = len(dims) - 1
    keys = jax.random.split(key, 2 * n_layers)
    for li in range(n_layers):
        fin, fout = dims[li], dims[li + 1]
        bound = 1.0 / jnp.sqrt(jnp.float32(fin))
        w = jax.random.uniform(keys[2 * li], (fin, fout), jnp.float32, -bound, bound)
        b = jax.random.uniform(keys[2 * li + 1], (1, fout), jnp.float32, -bound, bound)
        params += [w, b]
        is_bn_layer = li < n_layers - 1   # all but the output Linear get BN
        if is_bn_layer and BATCH_NORM_COND:
            gamma = jnp.ones((1, fout), jnp.float32)
            beta = jnp.zeros((1, fout), jnp.float32)
            params += [gamma, beta]
    return params


# ----------------------------- reference (plain JAX, PyTorch semantics) -----------------------------
def condnet_reference(x, params):
    n_bn_layers = 1 + NUM_HIDDEN_LAYERS_COND
    h = x.astype(jnp.float32)
    idx = 0
    for _ in range(n_bn_layers):
        w, b, g, be = params[idx], params[idx + 1], params[idx + 2], params[idx + 3]
        idx += 4
        h = h @ w + b
        mean = jnp.mean(h, axis=0, keepdims=True)
        var = jnp.mean((h - mean) ** 2, axis=0, keepdims=True)
        h = (h - mean) * jax.lax.rsqrt(var + BN_EPS) * g + be
        h = jnp.maximum(h, 0.0)
    return h @ params[idx] + params[idx + 1]


# ----------------------------- main -----------------------------
if __name__ == "__main__":
    key = jax.random.PRNGKey(0)
    k_x, k_p = jax.random.split(key)

    x = jax.random.normal(k_x, (BATCH, RESNET_REPRESENTATION_DIM), jnp.float32)
    params = init_params(k_p)

    # Pack once (weights stay in one slab; if called repeatedly, reuse `packed`).
    packed, layout = pack_params(params)

    out = condnet_forward(x, packed, layout)
    out = jax.block_until_ready(out)

    ref = condnet_reference(x, params)
    assert out.shape == (BATCH, NUM_COND_NODES)
    assert jnp.allclose(out, ref, atol=1e-4, rtol=1e-4), "Pallas kernel mismatch vs JAX reference"

    print("KERNEL_OK")
</pallas_src>

<mosaic_0001>
module attributes {stable_mosaic.version = 11 : i64} {
  func.func @_condnet_kernel(%arg0: memref<8x16xf32, #tpu.memory_space<vmem>>, %arg1: memref<144x32xf32, #tpu.memory_space<vmem>>, %arg2: memref<8x32xf32, #tpu.memory_space<vmem>>) attributes {dimension_semantics = [], scalar_prefetch = 0 : i64, scratch_operands = 0 : i64, tpu.core_type = #tpu.core_type<tc>} {
    %c0 = arith.constant 0 : index
    %c0_0 = arith.constant 0 : index
    %0 = vector.load %arg0[%c0, %c0_0] : memref<8x16xf32, #tpu.memory_space<vmem>>, vector<8x16xf32>
    %c0_1 = arith.constant 0 : index
    %c0_2 = arith.constant 0 : index
    %1 = vector.load %arg1[%c0_1, %c0_2] : memref<144x32xf32, #tpu.memory_space<vmem>>, vector<16x32xf32>
    %c16 = arith.constant 16 : index
    %c0_3 = arith.constant 0 : index
    %2 = vector.load %arg1[%c16, %c0_3] : memref<144x32xf32, #tpu.memory_space<vmem>>, vector<1x32xf32>
    %c17 = arith.constant 17 : index
    %c0_4 = arith.constant 0 : index
    %3 = vector.load %arg1[%c17, %c0_4] : memref<144x32xf32, #tpu.memory_space<vmem>>, vector<1x32xf32>
    %cst = arith.constant dense<0.000000e+00> : vector<8x32xf32>
    %4 = tpu.matmul %0, %1, %cst {dimension_numbers = #tpu.dot_dimension_numbers<[1], [0], [0], [1], [0, 0, 1, 1], [], []>} : vector<8x16xf32>, vector<16x32xf32>, vector<8x32xf32> -> vector<8x32xf32>
    %cst_5 = arith.constant dense<0.000000e+00> : vector<32xf32>
    %5 = vector.multi_reduction <add>, %4, %cst_5 [0] : vector<8x32xf32> to vector<32xf32>
    %6 = vector.shape_cast %5 : vector<32xf32> to vector<1x32xf32>
    %7 = arith.mulf %4, %4 : vector<8x32xf32>
    %cst_6 = arith.constant dense<0.000000e+00> : vector<32xf32>
    %8 = vector.multi_reduction <add>, %7, %cst_6 [0] : vector<8x32xf32> to vector<32xf32>
    %9 = vector.shape_cast %8 : vector<32xf32> to vector<1x32xf32>
    %cst_7 = arith.constant 1.250000e-01 : f32
    %10 = vector.broadcast %cst_7 : f32 to vector<1x32xf32>
    %11 = arith.mulf %6, %10 : vector<1x32xf32>
    %cst_8 = arith.constant 1.250000e-01 : f32
    %12 = vector.broadcast %cst_8 : f32 to vector<1x32xf32>
    %13 = arith.mulf %9, %12 : vector<1x32xf32>
    %14 = arith.mulf %11, %11 : vector<1x32xf32>
    %15 = arith.subf %13, %14 : vector<1x32xf32>
    %cst_9 = arith.constant 9.99999974E-6 : f32
    %16 = vector.broadcast %cst_9 : f32 to vector<1x32xf32>
    %17 = arith.addf %15, %16 : vector<1x32xf32>
    %18 = math.rsqrt %17 : vector<1x32xf32>
    %19 = arith.mulf %2, %18 : vector<1x32xf32>
    %20 = vector.broadcast %19 : vector<1x32xf32> to vector<8x32xf32>
    %21 = arith.mulf %4, %20 : vector<8x32xf32>
    %22 = arith.mulf %11, %19 : vector<1x32xf32>
    %23 = arith.subf %3, %22 : vector<1x32xf32>
    %24 = vector.broadcast %23 : vector<1x32xf32> to vector<8x32xf32>
    %25 = arith.addf %21, %24 : vector<8x32xf32>
    %cst_10 = arith.constant 0.000000e+00 : f32
    %26 = vector.broadcast %cst_10 : f32 to vector<8x32xf32>
    %27 = arith.maximumf %25, %26 : vector<8x32xf32>
    %c24 = arith.constant 24 : index
    %c0_11 = arith.constant 0 : index
    %28 = vector.load %arg1[%c24, %c0_11] : memref<144x32xf32, #tpu.memory_space<vmem>>, vector<32x32xf32>
    %c56 = arith.constant 56 : index
    %c0_12 = arith.constant 0 : index
    %29 = vector.load %arg1[%c56, %c0_12] : memref<144x32xf32, #tpu.memory_space<vmem>>, vector<1x32xf32>
    %c57 = arith.constant 57 : index
    %c0_13 = arith.constant 0 : index
    %30 = vector.load %arg1[%c57, %c0_13] : memref<144x32xf32, #tpu.memory_space<vmem>>, vector<1x32xf32>
    %cst_14 = arith.constant dense<0.000000e+00> : vector<8x32xf32>
    %31 = tpu.matmul %27, %28, %cst_14 {dimension_numbers = #tpu.dot_dimension_numbers<[1], [0], [0], [1], [0, 0, 1, 1], [], []>} : vector<8x32xf32>, vector<32x32xf32>, vector<8x32xf32> -> vector<8x32xf32>
    %cst_15 = arith.constant dense<0.000000e+00> : vector<32xf32>
    %32 = vector.multi_reduction <add>, %31, %cst_15 [0] : vector<8x32xf32> to vector<32xf32>
    %33 = vector.shape_cast %32 : vector<32xf32> to vector<1x32xf32>
    %34 = arith.mulf %31, %31 : vector<8x32xf32>
    %cst_16 = arith.constant dense<0.000000e+00> : vector<32xf32>
    %35 = vector.multi_reduction <add>, %34, %cst_16 [0] : vector<8x32xf32> to vector<32xf32>
    %36 = vector.shape_cast %35 : vector<32xf32> to vector<1x32xf32>
    %cst_17 = arith.constant 1.250000e-01 : f32
    %37 = vector.broadcast %cst_17 : f32 to vector<1x32xf32>
    %38 = arith.mulf %33, %37 : vector<1x32xf32>
    %cst_18 = arith.constant 1.250000e-01 : f32
    %39 = vector.broadcast %cst_18 : f32 to vector<1x32xf32>
    %40 = arith.mulf %36, %39 : vector<1x32xf32>
    %41 = arith.mulf %38, %38 : vector<1x32xf32>
    %42 = arith.subf %40, %41 : vector<1x32xf32>
    %cst_19 = arith.constant 9.99999974E-6 : f32
    %43 = vector.broadcast %cst_19 : f32 to vector<1x32xf32>
    %44 = arith.addf %42, %43 : vector<1x32xf32>
    %45 = math.rsqrt %44 : vector<1x32xf32>
    %46 = arith.mulf %29, %45 : vector<1x32xf32>
    %47 = vector.broadcast %46 : vector<1x32xf32> to vector<8x32xf32>
    %48 = arith.mulf %31, %47 : vector<8x32xf32>
    %49 = arith.mulf %38, %46 : vector<1x32xf32>
    %50 = arith.subf %30, %49 : vector<1x32xf32>
    %51 = vector.broadcast %50 : vector<1x32xf32> to vector<8x32xf32>
    %52 = arith.addf %48, %51 : vector<8x32xf32>
    %cst_20 = arith.constant 0.000000e+00 : f32
    %53 = vector.broadcast %cst_20 : f32 to vector<8x32xf32>
    %54 = arith.maximumf %52, %53 : vector<8x32xf32>
    %c64 = arith.constant 64 : index
    %c0_21 = arith.constant 0 : index
    %55 = vector.load %arg1[%c64, %c0_21] : memref<144x32xf32, #tpu.memory_space<vmem>>, vector<32x32xf32>
    %c96 = arith.constant 96 : index
    %c0_22 = arith.constant 0 : index
    %56 = vector.load %arg1[%c96, %c0_22] : memref<144x32xf32, #tpu.memory_space<vmem>>, vector<1x32xf32>
    %c97 = arith.constant 97 : index
    %c0_23 = arith.constant 0 : index
    %57 = vector.load %arg1[%c97, %c0_23] : memref<144x32xf32, #tpu.memory_space<vmem>>, vector<1x32xf32>
    %cst_24 = arith.constant dense<0.000000e+00> : vector<8x32xf32>
    %58 = tpu.matmul %54, %55, %cst_24 {dimension_numbers = #tpu.dot_dimension_numbers<[1], [0], [0], [1], [0, 0, 1, 1], [], []>} : vector<8x32xf32>, vector<32x32xf32>, vector<8x32xf32> -> vector<8x32xf32>
    %cst_25 = arith.constant dense<0.000000e+00> : vector<32xf32>
    %59 = vector.multi_reduction <add>, %58, %cst_25 [0] : vector<8x32xf32> to vector<32xf32>
    %60 = vector.shape_cast %59 : vector<32xf32> to vector<1x32xf32>
    %61 = arith.mulf %58, %58 : vector<8x32xf32>
    %cst_26 = arith.constant dense<0.000000e+00> : vector<32xf32>
    %62 = vector.multi_reduction <add>, %61, %cst_26 [0] : vector<8x32xf32> to vector<32xf32>
    %63 = vector.shape_cast %62 : vector<32xf32> to vector<1x32xf32>
    %cst_27 = arith.constant 1.250000e-01 : f32
    %64 = vector.broadcast %cst_27 : f32 to vector<1x32xf32>
    %65 = arith.mulf %60, %64 : vector<1x32xf32>
    %cst_28 = arith.constant 1.250000e-01 : f32
    %66 = vector.broadcast %cst_28 : f32 to vector<1x32xf32>
    %67 = arith.mulf %63, %66 : vector<1x32xf32>
    %68 = arith.mulf %65, %65 : vector<1x32xf32>
    %69 = arith.subf %67, %68 : vector<1x32xf32>
    %cst_29 = arith.constant 9.99999974E-6 : f32
    %70 = vector.broadcast %cst_29 : f32 to vector<1x32xf32>
    %71 = arith.addf %69, %70 : vector<1x32xf32>
    %72 = math.rsqrt %71 : vector<1x32xf32>
    %73 = arith.mulf %56, %72 : vector<1x32xf32>
    %74 = vector.broadcast %73 : vector<1x32xf32> to vector<8x32xf32>
    %75 = arith.mulf %58, %74 : vector<8x32xf32>
    %76 = arith.mulf %65, %73 : vector<1x32xf32>
    %77 = arith.subf %57, %76 : vector<1x32xf32>
    %78 = vector.broadcast %77 : vector<1x32xf32> to vector<8x32xf32>
    %79 = arith.addf %75, %78 : vector<8x32xf32>
    %cst_30 = arith.constant 0.000000e+00 : f32
    %80 = vector.broadcast %cst_30 : f32 to vector<8x32xf32>
    %81 = arith.maximumf %79, %80 : vector<8x32xf32>
    %c104 = arith.constant 104 : index
    %c0_31 = arith.constant 0 : index
    %82 = vector.load %arg1[%c104, %c0_31] : memref<144x32xf32, #tpu.memory_space<vmem>>, vector<32x32xf32>
    %c136 = arith.constant 136 : index
    %c0_32 = arith.constant 0 : index
    %83 = vector.load %arg1[%c136, %c0_32] : memref<144x32xf32, #tpu.memory_space<vmem>>, vector<1x32xf32>
    %cst_33 = arith.constant dense<0.000000e+00> : vector<8x32xf32>
    %84 = tpu.matmul %81, %82, %cst_33 {dimension_numbers = #tpu.dot_dimension_numbers<[1], [0], [0], [1], [0, 0, 1, 1], [], []>} : vector<8x32xf32>, vector<32x32xf32>, vector<8x32xf32> -> vector<8x32xf32>
    %85 = vector.broadcast %83 : vector<1x32xf32> to vector<8x32xf32>
    %86 = arith.addf %84, %85 : vector<8x32xf32>
    %c0_34 = arith.constant 0 : index
    %c0_35 = arith.constant 0 : index
    %87 = vector.load %arg2[%c0_34, %c0_35] : memref<8x32xf32, #tpu.memory_space<vmem>>, vector<8x32xf32>
    tpu.vector_store %arg2[%c0_34, %c0_35], %86 {strides = array<i32>} : memref<8x32xf32, #tpu.memory_space<vmem>>, vector<8x32xf32>,
    return
  }
}

</mosaic_0001>

<bundles_post_ra>
// kernel: tpu_custom_call.1
= control target key start
LH: loop header
LB: loop body
LE: loop exit
PB: predicated region body
PF: predicated region fallthrough
CT: control target
= control target key end

     0   :  { %v546_v1 = vmov 0.0   ;;  %vm547_vm0 = vmmov 0   ;;  %s673_s0 = inlined_call_operand.vmem [shape: f32[8,16], index: 0, kind: input, shape index: {}]   ;;  %s674_s1 = inlined_call_operand.vmem [shape: f32[144,32], index: 1, kind: input, shape index: {}]   ;;  %s675_s2 = inlined_call_operand.hbm [shape: f32[8,32], index: 2, kind: output, shape index: {}]  }
   0x1   :  { %v14_v0 = vld [vmem:[%s674_s1 + $0x8] sm:$0xff]  ;;  %475 = vmatprep.subr.mxu0 %v546_v1  ;;  %v13_v2 = vld [vmem:[%s674_s1] sm:$0xff]  ;;  %479 = vmatprep.mubr.msk.f32.mxu0 %vm547_vm0, %v546_v1 }
   0x2   :  { %7 = vsyncpa [#allocation3], 0  ;;  %476 = vmatpush3.msra.mxu0 %v14_v0  ;;  %v12_v3 = vld [vmem:[%s673_s0] sm:$0xff]  ;;  %vm17_vm1 = vcmask 130048   ;;  %482 = vmatprep.subr.mxu1 %v546_v1  ;;  %v130_v4 = vld [vmem:[%s674_s1 + $0x30] sm:$0xff]  ;;  %vm91_vm2 = vcmask 261120   ;;  %v114_v30 = vlaneseq }
   0x3   :  { %477 = vmatprep.subr.mxu0 %v546_v1  ;;  %490 = vmatprep.mubr.msk.f32.mxu1 %vm547_vm0, %v546_v1  ;;  %v129_v5 = vld [vmem:[%s674_s1 + $0x28] sm:$0xff]  ;;  %v128_v6 = vld [vmem:[%s674_s1 + $0x20] sm:$0xff]  ;;  %v127_v7 = vld [vmem:[%s674_s1 + $0x18] sm:$0xff]  ;;  %s548_s23 = smov [#allocation2]  }
   0x4   :  { %478 = vmatpush3.msra.mxu0 %v13_v2  ;;  %483 = vmatpush3.msra.mxu1 %v130_v4  ;;  %v115_v31 = vshrl.u32 %v114_v30, 7  ;;  %v15_v32 = vld [vmem:[%s674_s1 + $0x10] sm:$0x1]  ;;  %v16_v36 = vld [vmem:[%s674_s1 + $0x11] sm:$0x1]  ;;  %v244_v44 = vld [vmem:[%s674_s1 + $0x58] sm:$0xff] }
   0x5   :  { %480 = vmatmul.mubr.msk.f32.vlgmr.msra.gmra.mxu0 %vm17_vm1, %v12_v3  ;;  %493 = vmatprep.subr.mxu0 %v546_v1  ;;  %v243_v45 = vld [vmem:[%s674_s1 + $0x50] sm:$0xff]  ;;  %v242_v46 = vld [vmem:[%s674_s1 + $0x48] sm:$0xff]  ;;  %v241_v47 = vld [vmem:[%s674_s1 + $0x40] sm:$0xff]  ;;  %s444_s24 = sshll.u32 %s548_s23, 4  ;;  %s445_s24 = int_to_ptr.vmem [resolvable:$true] %s444_s24 }
   0x6   :  { %501 = vmatprep.mubr.msk.f32.mxu0 %vm547_vm0, %v546_v1  ;;  %484 = vmatprep.subr.mxu1 %v546_v1  ;;  %v604_v33 = vsub.s32 0, %v115_v31  ;;  %s524_s25 = scalar_lea.vmem %s445_s24, 128  ;;  %p529_p1 = scmp.lt.s32.totalorder %s445_s24, %s445_s24 }
   0x7   :  { %485 = vmatpush3.msra.mxu1 %v129_v5  ;;  %494 = vmatpush3.msra.mxu0 %v244_v44  ;;  %v245_v44 = vld [vmem:[%s674_s1 + $0x60] sm:$0x1]  ;;  %p525_p0 = scmp.ne.s32.totalorder %s445_s24, %s524_s25  ;;  %p530_p2 = scmp.lt.s32.totalorder %s524_s25, %s524_s25 }
   0x8   :  { %486 = vmatprep.subr.mxu1 %v546_v1  ;;  %495 = vmatprep.subr.mxu0 %v546_v1 }
   0x9   :  { %487 = vmatpush3.msra.mxu1 %v128_v6  ;;  %496 = vmatpush3.msra.mxu0 %v243_v45  ;;  %p531_p3 = por %p530_p2, %p529_p1 }
   0xa   :  { %488 = vmatprep.subr.mxu1 %v546_v1  ;;  %497 = vmatprep.subr.mxu0 %v546_v1 }
   0xb   :  { %489 = vmatpush3.msra.mxu1 %v127_v7  ;;  %498 = vmatpush3.msra.mxu0 %v242_v46  ;;  %v131_v7 = vld [vmem:[%s674_s1 + $0x38] sm:$0x1]  ;;  %p532_p4 = pnand %p531_p3, %p525_p0 }
   0xc   :  { %504 = vmatprep.subr.mxu1 %v546_v1  ;;  %499 = vmatprep.subr.mxu0 %v546_v1 }
   0xd   :  { %500 = vmatpush3.msra.mxu0 %v241_v47  ;;  %v246_v47 = vld [vmem:[%s674_s1 + $0x61] sm:$0x1] }
  0xc5   :  { %v87_v8 = vpop.f32.mrf.mxu0 }
  0xc6   :  { %v92_v9 = vsel %vm91_vm2, %v87_v8, 0.0  ;;  %v99_v10 = vmul.f32 %v87_v8, %v87_v8 }
  0xc7   :  { %v93_v11 = vrot.slane %v92_v9, 4  ;;  %v481_v12 = vpop.f32.mrf.mxu0 }
  0xc8   :  { %v100_v13 = vsel %vm91_vm2, %v99_v10, 0.0  ;;  %v132_v10 = vld [vmem:[%s674_s1 + $0x39] sm:$0x1] }
  0xc9   :  { %v94_v14 = vadd.f32 %v93_v11, %v92_v9  ;;  %v101_v15 = vrot.slane %v100_v13, 4 }
  0xcb   :  { %v95_v16 = vrot.slane %v94_v14, 2  ;;  %v102_v17 = vadd.f32 %v101_v15, %v100_v13 }
  0xcd   :  { %v96_v18 = vadd.f32 %v95_v16, %v94_v14  ;;  %v103_v19 = vrot.slane %v102_v17, 2 }
  0xcf   :  { %v97_v20 = vrot.slane %v96_v18, 1  ;;  %v104_v21 = vadd.f32 %v103_v19, %v102_v17  ;;  %v357_v19 = vld [vmem:[%s674_s1 + $0x78] sm:$0xff] }
  0xd1   :  { %v98_v22 = vadd.f32 %v97_v20, %v96_v18  ;;  %v105_v23 = vrot.slane %v104_v21, 1  ;;  %v358_v18 = vld [vmem:[%s674_s1 + $0x80] sm:$0xff]  ;;  %v356_v20 = vld [vmem:[%s674_s1 + $0x70] sm:$0xff] }
  0xd3   :  { %v106_v24 = vadd.f32 %v105_v23, %v104_v21  ;;  %v107_v25 = vmul.f32 0.125, %v98_v22  ;;  %v355_v21 = vld [vmem:[%s674_s1 + $0x68] sm:$0xff] }
  0xd5   :  { %v108_v26 = vmul.f32 0.125, %v106_v24  ;;  %v109_v27 = vmul.f32 %v107_v25, %v107_v25 }
  0xd7   :  { %v110_v28 = vsub.f32 %v108_v26, %v109_v27 }
  0xd9   :  { %v111_v29 = vadd.f32 1e-05, %v110_v28 }
  0xdb   :  { %518 = vrsqrt.f32 %v111_v29 }
  0xe8   :  { %v519_v34 = vpop.eup %518 }
  0xe9   :  { %v113_v35 = vmul.f32 %v519_v34, %v15_v32 }
  0xeb   :  { %v117_v37 = vrot.slane %v113_v35, %v604_v33  ;;  %v119_v38 = vmul.f32 %v113_v35, %v107_v25 }
  0xed   :  { %v120_v39 = vsub.f32 %v16_v36, %v119_v38  ;;  %v118_v40 = vmul.f32 %v117_v37, %v87_v8 }
  0xef   :  { %v124_v41 = vrot.slane %v120_v39, %v604_v33 }
  0xf1   :  { %v125_v42 = vadd.f32 %v124_v41, %v118_v40 }
  0xf3   :  { %v126_v43 = vmax.f32 %v125_v42, 0.0 }
  0xf5   :  { %491 = vmatmul.mubr.msk.f32.vlgmr.msra.gmra.mxu1 %vm91_vm2, %v126_v43 }
  0xf6   :  { %512 = vmatprep.mubr.msk.f32.mxu1 %vm547_vm0, %v546_v1  ;;  %505 = vmatpush3.msra.mxu1 %v358_v18 }
  0xf7   :  { %506 = vmatprep.subr.mxu1 %v546_v1 }
  0xf8   :  { %507 = vmatpush3.msra.mxu1 %v357_v19 }
  0xf9   :  { %508 = vmatprep.subr.mxu1 %v546_v1 }
  0xfa   :  { %509 = vmatpush3.msra.mxu1 %v356_v20 }
  0xfb   :  { %510 = vmatprep.subr.mxu1 %v546_v1 }
  0xfc   :  { %511 = vmatpush3.msra.mxu1 %v355_v21 }
 0x1b5   :  { %v202_v48 = vpop.f32.mrf.mxu1 }
 0x1b6   :  { %v206_v49 = vsel %vm91_vm2, %v202_v48, 0.0  ;;  %v213_v50 = vmul.f32 %v202_v48, %v202_v48 }
 0x1b7   :  { %v207_v51 = vrot.slane %v206_v49, 4  ;;  %v492_v52 = vpop.f32.mrf.mxu1 }
 0x1b8   :  { %v214_v53 = vsel %vm91_vm2, %v213_v50, 0.0 }
 0x1b9   :  { %v208_v54 = vadd.f32 %v207_v51, %v206_v49  ;;  %v215_v55 = vrot.slane %v214_v53, 4 }
 0x1bb   :  { %v209_v56 = vrot.slane %v208_v54, 2  ;;  %v216_v57 = vadd.f32 %v215_v55, %v214_v53  ;;  %v455_v55 = vld [vmem:[%s674_s1 + $0x88] ss:$0 sm:$0xff] }
 0x1bd   :  { %v210_v58 = vadd.f32 %v209_v56, %v208_v54  ;;  %v217_v59 = vrot.slane %v216_v57, 2 }
 0x1bf   :  { %v211_v60 = vrot.slane %v210_v58, 1  ;;  %v218_v61 = vadd.f32 %v217_v59, %v216_v57 }
 0x1c1   :  { %v212_v62 = vadd.f32 %v211_v60, %v210_v58  ;;  %v219_v63 = vrot.slane %v218_v61, 1 }
 0x1c3   :  { %v220_v0 = vadd.f32 %v219_v63, %v218_v61  ;;  %v221_v2 = vmul.f32 0.125, %v212_v62 }
 0x1c5   :  { %v222_v3 = vmul.f32 0.125, %v220_v0  ;;  %v223_v4 = vmul.f32 %v221_v2, %v221_v2 }
 0x1c7   :  { %v224_v5 = vsub.f32 %v222_v3, %v223_v4 }
 0x1c9   :  { %v225_v6 = vadd.f32 1e-05, %v224_v5 }
 0x1cb   :  { %520 = vrsqrt.f32 %v225_v6 }
 0x1d8   :  { %v521_v8 = vpop.eup %520 }
 0x1d9   :  { %v227_v9 = vmul.f32 %v521_v8, %v131_v7 }
 0x1db   :  { %v231_v11 = vrot.slane %v227_v9, %v604_v33  ;;  %v233_v12 = vmul.f32 %v227_v9, %v221_v2 }
 0x1dd   :  { %v234_v13 = vsub.f32 %v132_v10, %v233_v12  ;;  %v232_v14 = vmul.f32 %v231_v11, %v202_v48 }
 0x1df   :  { %v238_v15 = vrot.slane %v234_v13, %v604_v33 }
 0x1e1   :  { %v239_v16 = vadd.f32 %v238_v15, %v232_v14 }
 0x1e3   :  { %v240_v17 = vmax.f32 %v239_v16, 0.0 }
 0x1e5   :  { %502 = vmatmul.mubr.msk.f32.vlgmr.msra.gmra.mxu0 %vm91_vm2, %v240_v17 }
 0x2a5   :  { %v316_v22 = vpop.f32.mrf.mxu0 }
 0x2a6   :  { %v320_v23 = vsel %vm91_vm2, %v316_v22, 0.0  ;;  %v327_v24 = vmul.f32 %v316_v22, %v316_v22 }
 0x2a7   :  { %v321_v25 = vrot.slane %v320_v23, 4  ;;  %v503_v26 = vpop.f32.mrf.mxu0 }
 0x2a8   :  { %v328_v27 = vsel %vm91_vm2, %v327_v24, 0.0 }
 0x2a9   :  { %v322_v28 = vadd.f32 %v321_v25, %v320_v23  ;;  %v329_v29 = vrot.slane %v328_v27, 4 }
 0x2ab   :  { %v323_v30 = vrot.slane %v322_v28, 2  ;;  %v330_v31 = vadd.f32 %v329_v29, %v328_v27 }
 0x2ad   :  { %v324_v32 = vadd.f32 %v323_v30, %v322_v28  ;;  %v331_v34 = vrot.slane %v330_v31, 2 }
 0x2af   :  { %v325_v1 = vrot.slane %v324_v32, 1  ;;  %v332_v35 = vadd.f32 %v331_v34, %v330_v31 }
 0x2b1   :  { %v326_v36 = vadd.f32 %v325_v1, %v324_v32  ;;  %v333_v37 = vrot.slane %v332_v35, 1 }
 0x2b3   :  { %v334_v38 = vadd.f32 %v333_v37, %v332_v35  ;;  %v335_v39 = vmul.f32 0.125, %v326_v36 }
 0x2b5   :  { %v336_v40 = vmul.f32 0.125, %v334_v38  ;;  %v337_v41 = vmul.f32 %v335_v39, %v335_v39 }
 0x2b7   :  { %v338_v42 = vsub.f32 %v336_v40, %v337_v41 }
 0x2b9   :  { %v339_v43 = vadd.f32 1e-05, %v338_v42 }
 0x2bb   :  { %522 = vrsqrt.f32 %v339_v43 }
 0x2c8   :  { %v523_v45 = vpop.eup %522 }
 0x2c9   :  { %v341_v46 = vmul.f32 %v523_v45, %v245_v44 }
 0x2cb   :  { %v345_v48 = vrot.slane %v341_v46, %v604_v33  ;;  %v347_v49 = vmul.f32 %v341_v46, %v335_v39 }
 0x2cd   :  { %v348_v50 = vsub.f32 %v246_v47, %v347_v49  ;;  %v346_v51 = vmul.f32 %v345_v48, %v316_v22 }
 0x2cf   :  { %v352_v52 = vrot.slane %v348_v50, %v604_v33 }
 0x2d1   :  { %v353_v53 = vadd.f32 %v352_v52, %v346_v51 }
 0x2d3   :  { %v354_v54 = vmax.f32 %v353_v53, 0.0 }
 0x2d5   :  { %513 = vmatmul.mubr.msk.f32.vlgmr.msra.gmra.mxu1 %vm91_vm2, %v354_v54 }
 0x395   :  { %v433_v56 = vpop.f32.mrf.mxu1 }
 0x396   :  { %v434_v57 = vadd.f32 %v455_v55, %v433_v56 }
 0x397   :  { %v514_v58 = vpop.f32.mrf.mxu1 }
 0x398   :  { %437 = vst.msk [vmem:[#allocation2] sm:$0xff] %vm91_vm2, %v434_v57 }
 0x399   :  { %535 = shalt.err (!%p532_p4)
}
 0x39a   :  { %447 = dma.vmem_to_hbm [thread:$0]  %s445_s24, 128, %s675_s2, [#allocation3]  }
 0x39b   :  { %544 = dma.done.wait [#allocation3], 128  }
 0x39c   :  { %545 = vsyncadd [#allocation3], 4294967168 }
 0x39d   :  { %451 = vsyncpa [#allocation3], 1 }

</bundles_post_ra>
